<compile_context>
chip_gen: v6e
topology: v6e:2x2x1
jax: 0.10.0
libtpu: 0.0.40
codegen_flags: <defaults>
</compile_context>

<pallas_src>
import jax
import jax.numpy as jnp
from jax import lax
from jax.experimental import pallas as pl
from jax.experimental.pallas import tpu as pltpu

_LN_EPS = 1e-5
_LANE = 128


# ----------------------------------------------------------------------------- kernels
def _sln_rowmajor_kernel(h_ref, w_ref, a_ref, b_ref, o_ref):
    """Standard path: one logical row per tile row, reduce over the last dim."""
    d = h_ref.shape[-1]
    inv_d = jnp.float32(1.0 / d)
    h = h_ref[...].astype(jnp.float32)
    # Issue both row reductions before the rsqrt (one-pass variance).
    s1 = jnp.sum(h, axis=-1, keepdims=True)
    s2 = jnp.sum(h * h, axis=-1, keepdims=True)
    mean = s1 * inv_d
    var = s2 * inv_d - mean * mean
    ln = (h - mean) * lax.rsqrt(var + _LN_EPS) * a_ref[...] + b_ref[...]
    # Multiply w in its native dtype (promotes at the mul; no early f32 copy).
    o_ref[...] = (ln * w_ref[...]).astype(o_ref.dtype)


def _sln_packed_kernel(h_ref, w_ref, a_ref, b_ref, g_ref, o_ref):
    """Lane-dense path for small D: `pack` rows per 128-lane row.

    g_ref is a (128, 128) block-diagonal matrix with 1/D entries, so
    x @ g gives each group's mean broadcast across that group's lanes.
    """
    h = h_ref[...].astype(jnp.float32)
    g = g_ref[...]
    mean = jnp.dot(h, g, preferred_element_type=jnp.float32,
                   precision=lax.Precision.HIGHEST)
    msq = jnp.dot(h * h, g, preferred_element_type=jnp.float32,
                  precision=lax.Precision.HIGHEST)
    var = msq - mean * mean
    ln = (h - mean) * lax.rsqrt(var + _LN_EPS) * a_ref[...] + b_ref[...]
    o_ref[...] = (ln * w_ref[...]).astype(o_ref.dtype)


# ----------------------------------------------------------------------------- helpers
def _round_up(x, m):
    return ((x + m - 1) // m) * m


def _sublane_multiple(dtype):
    # f32 -> 8, bf16 -> 16, int8/fp8 -> 32 (sub-32-bit dtypes pack along sublanes)
    bits = jnp.dtype(dtype).itemsize * 8
    return max(8, 256 // bits)


def _vmem_capacity_bytes():
    try:
        info = pltpu.get_tpu_info()
        cap = getattr(info, "vmem_capacity_bytes", None)
        if cap:
            return int(cap)
    except Exception:
        pass
    return 64 * 1024 * 1024  # v7x-conservative fallback


def _pick_tile_rows(n_lane_rows, lane_width, in_dtype, out_dtype, vmem_bytes):
    in_b = jnp.dtype(in_dtype).itemsize
    out_b = jnp.dtype(out_dtype).itemsize
    step = _sublane_multiple(in_dtype)
    # Per tile-row footprint: double-buffered h, w, out streams plus ~4
    # full-tile f32 temporaries materialized by the body.
    per_row = lane_width * (2 * (2 * in_b + out_b) + 4 * 4)
    budget = vmem_bytes // 2  # leave headroom below the explicit vmem limit
    tile = budget // max(per_row, 1)
    tile = max(step, (tile // step) * step)
    tile = min(tile, 4096)
    # Keep at least ~2 grid steps when there is enough work, so the single
    # grid axis shards across v7x's 2 TensorCores (no-op on v5e/v6e).
    half = _round_up(max(pl.cdiv(n_lane_rows, 2), 1), step)
    tile = min(tile, max(step, half))
    return tile


# ----------------------------------------------------------------------------- wrapper
def sln_forward(h, w, gamma, beta, ln_weight, ln_bias):
    """h, w: (B, S, D); gamma, beta: scalars; ln_weight, ln_bias: (D,)."""
    B, S, D = h.shape
    assert w.shape == h.shape
    out_dtype = h.dtype
    n_rows = B * S

    # Fold gamma/beta into the LN affine params (one-time (D,)-sized XLA op):
    #   gamma * (x_hat*lnw + lnb) + beta == x_hat*(gamma*lnw) + (gamma*lnb + beta)
    gamma = jnp.asarray(gamma, jnp.float32).reshape(())
    beta = jnp.asarray(beta, jnp.float32).reshape(())
    a = (gamma * ln_weight.astype(jnp.float32)).reshape(1, D)
    b = (gamma * ln_bias.astype(jnp.float32) + beta).reshape(1, D)

    h2 = h.reshape(n_rows, D)
    w2 = w.reshape(n_rows, D)

    # Lane-dense packing for small D.
    pack = _LANE // D if (D < _LANE and _LANE % D == 0) else 1
    lane_width = D * pack

    extra_args = []
    extra_specs = []
    if pack > 1:
        a = jnp.tile(a, (1, pack))
        b = jnp.tile(b, (1, pack))
        grp = jnp.arange(lane_width) // D
        gmat = (grp[:, None] == grp[None, :]).astype(jnp.float32) * jnp.float32(1.0 / D)
        extra_args.append(gmat)
        extra_specs.append(
            pl.BlockSpec((lane_width, lane_width), lambda i: (0, 0)))
        kernel = _sln_packed_kernel
    else:
        kernel = _sln_rowmajor_kernel

    vmem_bytes = _vmem_capacity_bytes()
    n_lane_rows = pl.cdiv(n_rows, pack)
    tile_rows = _pick_tile_rows(n_lane_rows, lane_width, h.dtype, out_dtype,
                                vmem_bytes)

    # Pad rows so the grid divides evenly (padding rows are zeros -> finite
    # outputs -> sliced off below).
    rows_per_tile = tile_rows * pack
    padded_rows = _round_up(n_rows, rows_per_tile)
    if padded_rows != n_rows:
        padding = padded_rows - n_rows
        h2 = jnp.pad(h2, ((0, padding), (0, 0)))
        w2 = jnp.pad(w2, ((0, padding), (0, 0)))
    R = padded_rows // pack
    h2 = h2.reshape(R, lane_width)
    w2 = w2.reshape(R, lane_width)

    grid = (R // tile_rows,)
    row_spec = pl.BlockSpec((tile_rows, lane_width), lambda i: (i, 0))
    vec_spec = pl.BlockSpec((1, lane_width), lambda i: (0, 0))

    out = pl.pallas_call(
        kernel,
        out_shape=jax.ShapeDtypeStruct((R, lane_width), out_dtype),
        grid_spec=pltpu.PrefetchScalarGridSpec(
            num_scalar_prefetch=0,
            grid=grid,
            in_specs=[row_spec, row_spec, vec_spec, vec_spec] + extra_specs,
            out_specs=row_spec,
        ),
        compiler_params=pltpu.CompilerParams(
            dimension_semantics=("parallel",),
            vmem_limit_bytes=int(vmem_bytes * 3 // 4),
        ),
    )(h2, w2, a, b, *extra_args)

    out = out.reshape(padded_rows, D)[:n_rows]
    return out.reshape(B, S, D)


# ----------------------------------------------------------------------------- reference / test
def _reference(h, w, gamma, beta, ln_weight, ln_bias):
    h32 = h.astype(jnp.float32)
    mean = jnp.mean(h32, axis=-1, keepdims=True)
    var = jnp.mean((h32 - mean) ** 2, axis=-1, keepdims=True)
    ln = (h32 - mean) / jnp.sqrt(var + _LN_EPS) * ln_weight + ln_bias
    return (gamma * w.astype(jnp.float32) * ln + beta * w.astype(jnp.float32)).astype(h.dtype)


if __name__ == "__main__":
    key = jax.random.PRNGKey(0)
    kh, kw, kg, kb, kwt, kbs = jax.random.split(key, 6)

    gamma = jax.random.normal(kg, ()).astype(jnp.float32)
    beta = jax.random.normal(kb, ()).astype(jnp.float32)

    # Two small configs: D=32 exercises the lane-dense packed path (module's
    # n_feats=32 example); D=128 exercises the standard row-major path.
    for (B, S, D) in [(2, 8, 32), (2, 8, 128)]:
        h = jax.random.normal(jax.random.fold_in(kh, D), (B, S, D), dtype=jnp.float32)
        w = jax.random.normal(jax.random.fold_in(kw, D), (B, S, D), dtype=jnp.float32)
        ln_weight = 1.0 + 0.1 * jax.random.normal(jax.random.fold_in(kwt, D), (D,), dtype=jnp.float32)
        ln_bias = 0.1 * jax.random.normal(jax.random.fold_in(kbs, D), (D,), dtype=jnp.float32)

        out = jax.block_until_ready(
            sln_forward(h, w, gamma, beta, ln_weight, ln_bias))
        ref = _reference(h, w, gamma, beta, ln_weight, ln_bias)

        assert out.shape == (B, S, D)
        assert jnp.allclose(out, ref, atol=3e-5, rtol=3e-5), f"mismatch vs reference at D={D}"

    print("KERNEL_OK")
</pallas_src>

<mosaic_0001>
module attributes {stable_mosaic.version = 11 : i64} {
  func.func @_sln_packed_kernel(%arg0: i32, %arg1: memref<8x128xf32, #tpu.memory_space<vmem>>, %arg2: memref<8x128xf32, #tpu.memory_space<vmem>>, %arg3: memref<1x128xf32, #tpu.memory_space<vmem>>, %arg4: memref<1x128xf32, #tpu.memory_space<vmem>>, %arg5: memref<128x128xf32, #tpu.memory_space<vmem>>, %arg6: memref<8x128xf32, #tpu.memory_space<vmem>>) attributes {dimension_semantics = [#tpu.dimension_semantics<parallel>], iteration_bounds = array<i64: 1>, scalar_prefetch = 0 : i64, scratch_operands = 0 : i64, tpu.core_type = #tpu.core_type<tc>, window_params = [{transform_indices = @transform_0, window_bounds = array<i64: 8, 128>}, {transform_indices = @transform_1, window_bounds = array<i64: 8, 128>}, {pipeline_mode = #tpu.pipeline_mode<synchronous>, transform_indices = @transform_2, window_bounds = array<i64: 1, 128>}, {pipeline_mode = #tpu.pipeline_mode<synchronous>, transform_indices = @transform_3, window_bounds = array<i64: 1, 128>}, {pipeline_mode = #tpu.pipeline_mode<synchronous>, transform_indices = @transform_4, window_bounds = array<i64: 128, 128>}, {transform_indices = @transform_5, window_bounds = array<i64: 8, 128>}]} {
    %c0 = arith.constant 0 : index
    %c0_0 = arith.constant 0 : index
    %0 = vector.load %arg1[%c0, %c0_0] : memref<8x128xf32, #tpu.memory_space<vmem>>, vector<8x128xf32>
    %c0_1 = arith.constant 0 : index
    %c0_2 = arith.constant 0 : index
    %1 = vector.load %arg5[%c0_1, %c0_2] : memref<128x128xf32, #tpu.memory_space<vmem>>, vector<128x128xf32>
    %cst = arith.constant dense<0.000000e+00> : vector<8x128xf32>
    %2 = tpu.matmul %0, %1, %cst {dimension_numbers = #tpu.dot_dimension_numbers<[1], [0], [0], [1], [0, 0, 1, 1], [], []>, precision = #tpu.contract_precision<fp32>} : vector<8x128xf32>, vector<128x128xf32>, vector<8x128xf32> -> vector<8x128xf32>
    %3 = arith.mulf %0, %0 : vector<8x128xf32>
    %cst_3 = arith.constant dense<0.000000e+00> : vector<8x128xf32>
    %4 = tpu.matmul %3, %1, %cst_3 {dimension_numbers = #tpu.dot_dimension_numbers<[1], [0], [0], [1], [0, 0, 1, 1], [], []>, precision = #tpu.contract_precision<fp32>} : vector<8x128xf32>, vector<128x128xf32>, vector<8x128xf32> -> vector<8x128xf32>
    %5 = arith.mulf %2, %2 : vector<8x128xf32>
    %6 = arith.subf %4, %5 : vector<8x128xf32>
    %7 = arith.subf %0, %2 : vector<8x128xf32>
    %cst_4 = arith.constant 9.99999974E-6 : f32
    %8 = vector.broadcast %cst_4 : f32 to vector<8x128xf32>
    %9 = arith.addf %6, %8 : vector<8x128xf32>
    %10 = math.rsqrt %9 : vector<8x128xf32>
    %11 = arith.mulf %7, %10 : vector<8x128xf32>
    %c0_5 = arith.constant 0 : index
    %c0_6 = arith.constant 0 : index
    %12 = vector.load %arg3[%c0_5, %c0_6] : memref<1x128xf32, #tpu.memory_space<vmem>>, vector<1x128xf32>
    %13 = vector.broadcast %12 : vector<1x128xf32> to vector<8x128xf32>
    %14 = arith.mulf %11, %13 : vector<8x128xf32>
    %c0_7 = arith.constant 0 : index
    %c0_8 = arith.constant 0 : index
    %15 = vector.load %arg4[%c0_7, %c0_8] : memref<1x128xf32, #tpu.memory_space<vmem>>, vector<1x128xf32>
    %16 = vector.broadcast %15 : vector<1x128xf32> to vector<8x128xf32>
    %17 = arith.addf %14, %16 : vector<8x128xf32>
    %c0_9 = arith.constant 0 : index
    %c0_10 = arith.constant 0 : index
    %18 = vector.load %arg2[%c0_9, %c0_10] : memref<8x128xf32, #tpu.memory_space<vmem>>, vector<8x128xf32>
    %19 = arith.mulf %17, %18 : vector<8x128xf32>
    %c0_11 = arith.constant 0 : index
    %c0_12 = arith.constant 0 : index
    %20 = vector.load %arg6[%c0_11, %c0_12] : memref<8x128xf32, #tpu.memory_space<vmem>>, vector<8x128xf32>
    tpu.vector_store %arg6[%c0_11, %c0_12], %19 {strides = array<i32>} : memref<8x128xf32, #tpu.memory_space<vmem>>, vector<8x128xf32>,
    return
  }
  func.func @transform_0(%arg0: i32) -> (i32, i32) {
    %c0_i32 = arith.constant 0 : i32
    %c0_i32_0 = arith.constant 0 : i32
    return %arg0, %c0_i32 : i32, i32
  }
  func.func @transform_1(%arg0: i32) -> (i32, i32) {
    %c0_i32 = arith.constant 0 : i32
    %c0_i32_0 = arith.constant 0 : i32
    return %arg0, %c0_i32 : i32, i32
  }
  func.func @transform_2(%arg0: i32) -> (i32, i32) {
    %c0_i32 = arith.constant 0 : i32
    %c0_i32_0 = arith.constant 0 : i32
    %c0_i32_1 = arith.constant 0 : i32
    return %c0_i32, %c0_i32_0 : i32, i32
  }
  func.func @transform_3(%arg0: i32) -> (i32, i32) {
    %c0_i32 = arith.constant 0 : i32
    %c0_i32_0 = arith.constant 0 : i32
    %c0_i32_1 = arith.constant 0 : i32
    return %c0_i32, %c0_i32_0 : i32, i32
  }
  func.func @transform_4(%arg0: i32) -> (i32, i32) {
    %c0_i32 = arith.constant 0 : i32
    %c0_i32_0 = arith.constant 0 : i32
    %c0_i32_1 = arith.constant 0 : i32
    return %c0_i32, %c0_i32_0 : i32, i32
  }
  func.func @transform_5(%arg0: i32) -> (i32, i32) {
    %c0_i32 = arith.constant 0 : i32
    %c0_i32_0 = arith.constant 0 : i32
    return %arg0, %c0_i32 : i32, i32
  }
}

</mosaic_0001>

<bundles_post_ra>
// kernel: tpu_custom_call.1
= control target key start
LH: loop header
LB: loop body
LE: loop exit
PB: predicated region body
PF: predicated region fallthrough
CT: control target
= control target key end

     0   :  { %10 = vsyncpa [#allocation3], 0  ;;  %s2814_s0 = inlined_call_operand.hbm [shape: f32[8,128], index: 0, kind: input, shape index: {}]   ;;  %s2815_s1 = inlined_call_operand.hbm [shape: f32[8,128], index: 1, kind: input, shape index: {}]   ;;  %s2816_s2 = inlined_call_operand.vmem [shape: f32[1,128], index: 2, kind: input, shape index: {}]   ;;  %s2817_s3 = inlined_call_operand.vmem [shape: f32[1,128], index: 3, kind: input, shape index: {}]   ;;  %s2818_s4 = inlined_call_operand.hbm [shape: f32[128,128], index: 4, kind: input, shape index: {}]   ;;  %s2819_s5 = inlined_call_operand.hbm [shape: f32[8,128], index: 5, kind: output, shape index: {}]  }
   0x1   :  { %11 = vsyncpa [#allocation6], 0 }
   0x2   :  { %12 = vsyncpa [#allocation4], 0  ;;  %s2121_s18 = smov [#allocation5]   ;;  %s2122_s20 = smov [#allocation2]  }
   0x3   :  { %s29_s19 = sshll.u32 %s2121_s18, 4  ;;  %s19_s21 = sshll.u32 %s2122_s20, 4  ;;  %s30_s19 = int_to_ptr.vmem [resolvable:$true] %s29_s19  ;;  %s20_s21 = int_to_ptr.vmem [resolvable:$true] %s19_s21 }
   0x4   :  { %s2043_s22 = scalar_lea.vmem %s30_s19, 128  ;;  %p2048_p1 = scmp.lt.s32.totalorder %s30_s19, %s30_s19 }
   0x5   :  { %p2044_p0 = scmp.ne.s32.totalorder %s30_s19, %s2043_s22  ;;  %p2049_p2 = scmp.lt.s32.totalorder %s2043_s22, %s2043_s22 }
   0x7   :  { %p2050_p3 = por %p2049_p2, %p2048_p1 }
   0x9   :  { %p2051_p4 = pnand %p2050_p3, %p2044_p0 }
   0xb   :  { %2054 = shalt.err (!%p2051_p4)
}
   0xc   :  { %32 = dma.hbm_to_vmem [thread:$0]  %s2815_s1, 128, %s30_s19, [#allocation6]  }
   0xd   :  { %s2063_s25 = scalar_lea.vmem %s20_s21, 128  ;;  %p2068_p6 = scmp.lt.s32.totalorder %s20_s21, %s20_s21 }
   0xe   :  { %p2064_p5 = scmp.ne.s32.totalorder %s20_s21, %s2063_s25  ;;  %p2069_p7 = scmp.lt.s32.totalorder %s2063_s25, %s2063_s25 }
  0x10   :  { %p2070_p8 = por %p2069_p7, %p2068_p6 }
  0x12   :  { %p2071_p9 = pnand %p2070_p8, %p2064_p5 }
  0x14   :  { %2074 = shalt.err (!%p2071_p9)
}
  0x15   :  { %22 = dma.hbm_to_vmem [thread:$0]  %s2814_s0, 128, %s20_s21, [#allocation3]  }
  0x16   :  { %s2123_s28 = smov [#allocation7]  }
  0x17   :  { %s42_s29 = sshll.u32 %s2123_s28, 4  ;;  %s43_s29 = int_to_ptr.vmem [resolvable:$true] %s42_s29 }
  0x18   :  { %s2083_s30 = scalar_lea.vmem %s43_s29, 2048  ;;  %p2088_p11 = scmp.lt.s32.totalorder %s43_s29, %s43_s29 }
  0x19   :  { %p2084_p10 = scmp.ne.s32.totalorder %s43_s29, %s2083_s30  ;;  %p2089_p12 = scmp.lt.s32.totalorder %s2083_s30, %s2083_s30 }
  0x1b   :  { %p2090_p13 = por %p2089_p12, %p2088_p11 }
  0x1d   :  { %p2091_p0 = pnand %p2090_p13, %p2084_p10 }
  0x1f   :  { %2094 = shalt.err (!%p2091_p0)
}
  0x20   :  { %s2124_s1 = smov 128   ;;  %s2125_s6 = smov 8  }
  0x21   :  { %48 = dma.hbm_to_vmem [thread:$0]  %s2818_s4, 2048, %s43_s29, [#allocation6], %s2124_s1, %s2124_s1, %s2125_s6  }
  0x22   :  { %2115 = dma.done.wait [#allocation3], 128  }
  0x23   :  { %2116 = vsyncadd [#allocation3], 4294967168 }
  0x24   :  { %2117 = dma.done.wait [#allocation6], 2176  }
  0x25   :  { %2118 = vsyncadd [#allocation6], 4294965120  ;;  %v2126_v0 = vmov 0.0   ;;  %vm2127_vm0 = vmmov 0   ;;  %v74_v1 = vld [vmem:[#allocation7 + $0x78] sm:$0xff]  ;;  %v73_v2 = vld [vmem:[#allocation7 + $0x70] sm:$0xff] }
  0x26   :  { %1605 = vmatprep.subr.mxu0 %v2126_v0  ;;  %1640 = vmatprep.subr.mxu1 %v2126_v0  ;;  %v72_v3 = vld [vmem:[#allocation7 + $0x68] sm:$0xff]  ;;  %v2174_v4 = vand.u32 4294901760, %v74_v1  ;;  %v2176_v5 = vand.u32 4294901760, %v73_v2  ;;  %v71_v7 = vld [vmem:[#allocation7 + $0x60] sm:$0xff]  ;;  %v70_v8 = vld [vmem:[#allocation7 + $0x58] sm:$0xff]  ;;  %s2128_s11 = smov [#allocation8]  }
  0x27   :  { %1637 = vmatprep.mubr.msk.f32.mxu0 %vm2127_vm0, %v2126_v0  ;;  %1672 = vmatprep.mubr.msk.f32.mxu1 %vm2127_vm0, %v2126_v0  ;;  %v2178_v6 = vand.u32 4294901760, %v72_v3  ;;  %v69_v9 = vld [vmem:[#allocation7 + $0x50] sm:$0xff]  ;;  %v2180_v10 = vand.u32 4294901760, %v71_v7  ;;  %v2182_v11 = vand.u32 4294901760, %v70_v8  ;;  %v68_v13 = vld [vmem:[#allocation7 + $0x48] sm:$0xff]  ;;  %v67_v14 = vld [vmem:[#allocation7 + $0x40] sm:$0xff] }
  0x28   :  { %v2184_v12 = vand.u32 4294901760, %v69_v9  ;;  %1606 = vmatpush3.msra.mxu0 %v2174_v4  ;;  %v2188_v15 = vsub.f32 %v74_v1, %v2174_v4  ;;  %v2191_v16 = vsub.f32 %v73_v2, %v2176_v5  ;;  %v2193_v17 = vand.u32 4294901760, %v68_v13  ;;  %v66_v19 = vld [vmem:[#allocation7 + $0x38] sm:$0xff]  ;;  %v65_v26 = vld [vmem:[#allocation7 + $0x30] sm:$0xff]  ;;  %v64_v36 = vld [vmem:[#allocation7 + $0x28] sm:$0xff]  ;;  %s1389_s12 = sshll.u32 %s2128_s11, 4  ;;  %s1390_s12 = int_to_ptr.vmem [resolvable:$true] %s1389_s12 }
  0x29   :  { %v2196_v18 = vsub.f32 %v72_v3, %v2178_v6  ;;  %1607 = vmatprep.subr.mxu0 %v2126_v0  ;;  %v2200_v20 = vsub.f32 %v71_v7, %v2180_v10  ;;  %v2203_v21 = vsub.f32 %v70_v8, %v2182_v11  ;;  %v2215_v25 = vand.u32 4294901760, %v67_v14  ;;  %v63_v41 = vld [vmem:[#allocation7 + $0x20] sm:$0xff]  ;;  %v62_v49 = vld [vmem:[#allocation7 + $0x18] sm:$0xff]  ;;  %v2274_v50 = vld [vmem:[#allocation2] sm:$0xff]  ;;  %s2095_s13 = scalar_lea.vmem %s1390_s12, 128  ;;  %p2100_p2 = scmp.lt.s32.totalorder %s1390_s12, %s1390_s12 }
  0x2a   :  { %1608 = vmatpush3.msra.mxu0 %v2176_v5  ;;  %v2207_v22 = vand.u32 4294901760, %v2188_v15  ;;  %v2210_v23 = vand.u32 4294901760, %v2191_v16  ;;  %v2221_v28 = vand.u32 4294901760, %v66_v19  ;;  %v2227_v30 = vsub.f32 %v69_v9, %v2184_v12  ;;  %v61_v54 = vld [vmem:[#allocation7 + $0x10] sm:$0xff]  ;;  %v60_v60 = vld [vmem:[#allocation7 + $0x8] sm:$0xff]  ;;  %v59_v7 = vld [vmem:[#allocation7] sm:$0xff]  ;;  %p2096_p1 = scmp.ne.s32.totalorder %s1390_s12, %s2095_s13  ;;  %p2101_p3 = scmp.lt.s32.totalorder %s2095_s13, %s2095_s13 }
  0x2b   :  { %v2213_v24 = vand.u32 4294901760, %v2196_v18  ;;  %1609 = vmatprep.subr.mxu0 %v2126_v0  ;;  %v2219_v27 = vand.u32 4294901760, %v2200_v20  ;;  %v2224_v29 = vand.u32 4294901760, %v2203_v21  ;;  %v2237_v34 = vsub.f32 %v68_v13, %v2193_v17 }
  0x2c   :  { %1610 = vmatpush3.msra.mxu0 %v2178_v6  ;;  %v170_v31 = vsub.f32 %v2188_v15, %v2207_v22  ;;  %v177_v32 = vsub.f32 %v2191_v16, %v2210_v23  ;;  %v2240_v35 = vand.u32 4294901760, %v65_v26  ;;  %v2250_v40 = vand.u32 4294901760, %v2227_v30  ;;  %p2102_p4 = por %p2101_p3, %p2100_p2 }
  0x2d   :  { %v184_v33 = vsub.f32 %v2196_v18, %v2213_v24  ;;  %1611 = vmatprep.subr.mxu0 %v2126_v0  ;;  %v191_v39 = vsub.f32 %v2200_v20, %v2219_v27  ;;  %v198_v42 = vsub.f32 %v2203_v21, %v2224_v29  ;;  %v2256_v43 = vsub.f32 %v67_v14, %v2215_v25 }
  0x2e   :  { %1612 = vmatpush3.msra.mxu0 %v2180_v10  ;;  %v2243_v37 = vand.u32 4294901760, %v170_v31  ;;  %v2245_v38 = vand.u32 4294901760, %v177_v32  ;;  %v2262_v45 = vand.u32 4294901760, %v64_v36  ;;  %v2265_v46 = vand.u32 4294901760, %v2237_v34  ;;  %p2103_p5 = pnand %p2102_p4, %p2096_p1 }
  0x2f   :  { %1613 = vmatprep.subr.mxu0 %v2126_v0  ;;  %v2260_v44 = vand.u32 4294901760, %v184_v33  ;;  %v2268_v47 = vsub.f32 %v66_v19, %v2221_v28  ;;  %v2272_v48 = vand.u32 4294901760, %v63_v41  ;;  %v2278_v51 = vand.u32 4294901760, %v191_v39 }
  0x30   :  { %1614 = vmatpush3.msra.mxu0 %v2182_v11  ;;  %1641 = vmatpush3.msra.mxu1 %v2243_v37  ;;  %v205_v52 = vsub.f32 %v2227_v30, %v2250_v40  ;;  %v2283_v53 = vand.u32 4294901760, %v2256_v43  ;;  %v2286_v55 = vsub.f32 %v65_v26, %v2240_v35  ;;  %v2290_v56 = vand.u32 4294901760, %v198_v42 }
  0x31   :  { %2828 = vst [vmem:[#allocation12_spill] sm:$0xff] %v2260_v44  ;;  %1615 = vmatprep.subr.mxu0 %v2126_v0  ;;  %1642 = vmatprep.subr.mxu1 %v2126_v0  ;;  %2829 = vst [vmem:[#allocation13_spill] sm:$0xff] %v2278_v51  ;;  %v2293_v57 = vand.u32 4294901760, %v2268_v47  ;;  %v212_v58 = vsub.f32 %v2237_v34, %v2265_v46  ;;  %v2299_v59 = vand.u32 4294901760, %v62_v49  ;;  %v2305_v62 = vand.u32 4294901760, %v2274_v50 }
  0x32   :  { %1616 = vmatpush3.msra.mxu0 %v2184_v12  ;;  %1643 = vmatpush3.msra.mxu1 %v2245_v38  ;;  %2830 = vst [vmem:[#allocation14_spill] sm:$0xff] %v2290_v56  ;;  %v2302_v61 = vsub.f32 %v64_v36, %v2262_v45  ;;  %v2309_v63 = vand.u32 4294901760, %v61_v54  ;;  %v2313_v1 = vand.u32 4294901760, %v205_v52  ;;  %v219_v2 = vsub.f32 %v2256_v43, %v2283_v53 }
  0x33   :  { %1617 = vmatprep.subr.mxu0 %v2126_v0  ;;  %1644 = vmatprep.subr.mxu1 %v2126_v0  ;;  %v2318_v3 = vand.u32 4294901760, %v2286_v55  ;;  %v2321_v8 = vsub.f32 %v63_v41, %v2272_v48  ;;  %v226_v9 = vsub.f32 %v2268_v47, %v2293_v57  ;;  %v2327_v13 = vand.u32 4294901760, %v60_v60 }
  0x34   :  { %1618 = vmatpush3.msra.mxu0 %v2193_v17  ;;  %1645 = vmatpush3.msra.mxu1 %v2260_v44  ;;  %2831 = vst [vmem:[#allocation15_spill] sm:$0xff] %v2313_v1  ;;  %v2331_v14 = vand.u32 4294901760, %v212_v58  ;;  %v2334_v19 = vand.u32 4294901760, %v2302_v61  ;;  %v2338_v26 = vsub.f32 %v2274_v50, %v2305_v62  ;;  %v2341_v31 = vsub.f32 %v62_v49, %v2299_v59 }
  0x35   :  { %1619 = vmatprep.subr.mxu0 %v2126_v0  ;;  %1646 = vmatprep.subr.mxu1 %v2126_v0  ;;  %v2345_v32 = vand.u32 4294901760, %v59_v7  ;;  %v2349_v33 = vand.u32 4294901760, %v219_v2  ;;  %v233_v36 = vsub.f32 %v2286_v55, %v2318_v3  ;;  %v2354_v39 = vand.u32 4294901760, %v2321_v8 }
  0x36   :  { %1620 = vmatpush3.msra.mxu0 %v2215_v25  ;;  %1647 = vmatpush3.msra.mxu1 %v2278_v51  ;;  %2832 = vst [vmem:[#allocation16_spill] sm:$0xff] %v2331_v14  ;;  %v2357_v41 = vsub.f32 %v61_v54, %v2309_v63  ;;  %v2361_v42 = vand.u32 4294901760, %v226_v9  ;;  %v240_v49 = vsub.f32 %v2302_v61, %v2334_v19  ;;  %v2369_v58 = vand.u32 4294901760, %v2341_v31 }
  0x37   :  { %1621 = vmatprep.subr.mxu0 %v2126_v0  ;;  %1648 = vmatprep.subr.mxu1 %v2126_v0  ;;  %2833 = vst [vmem:[#allocation17_spill] sm:$0xff] %v2349_v33  ;;  %v2372_v54 = vsub.f32 %v60_v60, %v2327_v13  ;;  %v2378_v2 = vand.u32 4294901760, %v233_v36  ;;  %v247_v9 = vsub.f32 %v2321_v8, %v2354_v39  ;;  %v2836_v36 = vand.u32 4294901760, %v2338_v26 }
  0x38   :  { %1622 = vmatpush3.msra.mxu0 %v2221_v28  ;;  %1649 = vmatpush3.msra.mxu1 %v2290_v56  ;;  %2834 = vst [vmem:[#allocation18_spill] sm:$0xff] %v2361_v42  ;;  %v2383_v52 = vand.u32 4294901760, %v2357_v41  ;;  %v2392_v60 = vand.u32 4294901760, %v240_v49 }
  0x39   :  { %1623 = vmatprep.subr.mxu0 %v2126_v0  ;;  %1650 = vmatprep.subr.mxu1 %v2126_v0  ;;  %2835 = vst [vmem:[#allocation19_spill] sm:$0xff] %v2378_v2  ;;  %v2406_v49 = vand.u32 4294901760, %v247_v9 }
  0x3a   :  { %1624 = vmatpush3.msra.mxu0 %v2240_v35  ;;  %1651 = vmatpush3.msra.mxu1 %v2313_v1  ;;  %v254_v1 = vsub.f32 %v2341_v31, %v2369_v58 }
  0x3b   :  { %1625 = vmatprep.subr.mxu0 %v2126_v0  ;;  %1652 = vmatprep.subr.mxu1 %v2126_v0 }
  0x3c   :  { %1626 = vmatpush3.msra.mxu0 %v2262_v45  ;;  %1653 = vmatpush3.msra.mxu1 %v2331_v14  ;;  %v2386_v14 = vsub.f32 %v59_v7, %v2345_v32  ;;  %v2400_v7 = vand.u32 4294901760, %v2372_v54  ;;  %v2417_v51 = vand.u32 4294901760, %v254_v1 }
  0x3d   :  { %1627 = vmatprep.subr.mxu0 %v2126_v0  ;;  %1654 = vmatprep.subr.mxu1 %v2126_v0 }
  0x3e   :  { %1628 = vmatpush3.msra.mxu0 %v2272_v48  ;;  %1655 = vmatpush3.msra.mxu1 %v2349_v33  ;;  %v159_v33 = vsub.f32 %v2338_v26, %v2836_v36  ;;  %v2411_v36 = vand.u32 4294901760, %v2386_v14  ;;  %v268_v9 = vsub.f32 %v2372_v54, %v2400_v7 }
  0x3f   :  { %1629 = vmatprep.subr.mxu0 %v2126_v0  ;;  %1656 = vmatprep.subr.mxu1 %v2126_v0 }
  0x40   :  { %1630 = vmatpush3.msra.mxu0 %v2299_v59  ;;  %1657 = vmatpush3.msra.mxu1 %v2361_v42  ;;  %v261_v42 = vsub.f32 %v2357_v41, %v2383_v52  ;;  %v160_v56 = vand.u32 4294901760, %v159_v33  ;;  %v275_v44 = vsub.f32 %v2386_v14, %v2411_v36  ;;  %v2432_v1 = vand.u32 4294901760, %v268_v9  ;;  %v2841_v9 = vld [vmem:[#allocation15_spill] sm:$0xff] }
  0x41   :  { %1631 = vmatprep.subr.mxu0 %v2126_v0  ;;  %1658 = vmatprep.subr.mxu1 %v2126_v0 }
  0x42   :  { %1632 = vmatpush3.msra.mxu0 %v2309_v63  ;;  %1659 = vmatpush3.msra.mxu1 %v2378_v2  ;;  %v2425_v2 = vand.u32 4294901760, %v261_v42  ;;  %v2438_v33 = vand.u32 4294901760, %v275_v44  ;;  %v2837_v44 = vand.u32 4294901760, %v2338_v26 }
  0x43   :  { %1633 = vmatprep.subr.mxu0 %v2126_v0  ;;  %1660 = vmatprep.subr.mxu1 %v2126_v0 }
  0x44   :  { %1634 = vmatpush3.msra.mxu0 %v2327_v13  ;;  %1661 = vmatpush3.msra.mxu1 %v2392_v60 }
  0x45   :  { %1635 = vmatprep.subr.mxu0 %v2126_v0  ;;  %1662 = vmatprep.subr.mxu1 %v2126_v0 }
  0x46   :  { %1636 = vmatpush3.msra.mxu0 %v2345_v32  ;;  %1663 = vmatpush3.msra.mxu1 %v2406_v49 }
  0x47   :  { %1664 = vmatprep.subr.mxu1 %v2126_v0  ;;  %1675 = vmatprep.subr.mxu0 %v2126_v0 }
  0x48   :  { %1638 = vmatmul.mubr.f32.vlgmr.msra.gmra.mxu0 %v160_v56  ;;  %1665 = vmatpush3.msra.mxu1 %v2417_v51  ;;  %v716_v56 = vmul.f32 %v2274_v50, %v2274_v50 }
  0x49   :  { %1676 = vmatpush3.msra.mxu0 %v2188_v15  ;;  %1666 = vmatprep.subr.mxu1 %v2126_v0 }
  0x4a   :  { %1677 = vmatprep.subr.mxu0 %v2126_v0  ;;  %1667 = vmatpush3.msra.mxu1 %v2425_v2 }
  0x4b   :  { %1678 = vmatpush3.msra.mxu0 %v2191_v16  ;;  %1668 = vmatprep.subr.mxu1 %v2126_v0 }
  0x4c   :  { %1679 = vmatprep.subr.mxu0 %v2126_v0  ;;  %1669 = vmatpush3.msra.mxu1 %v2432_v1 }
  0x4d   :  { %1680 = vmatpush3.msra.mxu0 %v2196_v18  ;;  %1670 = vmatprep.subr.mxu1 %v2126_v0 }
  0x4e   :  { %1681 = vmatprep.subr.mxu0 %v2126_v0  ;;  %1671 = vmatpush3.msra.mxu1 %v2438_v33 }
  0x4f   :  { %1682 = vmatpush3.msra.mxu0 %v2200_v20  ;;  %1673 = vmatmul.mubr.f32.vlgmr.msra.gmra.mxu1 %v2305_v62 }
  0x50   :  { %1683 = vmatprep.subr.mxu0 %v2126_v0  ;;  %1710 = vmatprep.subr.mxu1 %v2126_v0 }
  0x51   :  { %1684 = vmatpush3.msra.mxu0 %v2203_v21  ;;  %1711 = vmatpush3.msra.mxu1 %v2174_v4 }
  0x52   :  { %1685 = vmatprep.subr.mxu0 %v2126_v0  ;;  %1712 = vmatprep.subr.mxu1 %v2126_v0 }
  0x53   :  { %1686 = vmatpush3.msra.mxu0 %v2227_v30  ;;  %1713 = vmatpush3.msra.mxu1 %v2176_v5 }
  0x54   :  { %1687 = vmatprep.subr.mxu0 %v2126_v0  ;;  %1714 = vmatprep.subr.mxu1 %v2126_v0 }
  0x55   :  { %1688 = vmatpush3.msra.mxu0 %v2237_v34  ;;  %1715 = vmatpush3.msra.mxu1 %v2178_v6 }
  0x56   :  { %1689 = vmatprep.subr.mxu0 %v2126_v0  ;;  %1716 = vmatprep.subr.mxu1 %v2126_v0 }
  0x57   :  { %1690 = vmatpush3.msra.mxu0 %v2256_v43  ;;  %1717 = vmatpush3.msra.mxu1 %v2180_v10 }
  0x58   :  { %1691 = vmatprep.subr.mxu0 %v2126_v0  ;;  %1718 = vmatprep.subr.mxu1 %v2126_v0 }
  0x59   :  { %1692 = vmatpush3.msra.mxu0 %v2268_v47  ;;  %1719 = vmatpush3.msra.mxu1 %v2182_v11 }
  0x5a   :  { %1693 = vmatprep.subr.mxu0 %v2126_v0  ;;  %1720 = vmatprep.subr.mxu1 %v2126_v0 }
  0x5b   :  { %1694 = vmatpush3.msra.mxu0 %v2286_v55  ;;  %1721 = vmatpush3.msra.mxu1 %v2184_v12 }
  0x5c   :  { %1695 = vmatprep.subr.mxu0 %v2126_v0  ;;  %1722 = vmatprep.subr.mxu1 %v2126_v0 }
  0x5d   :  { %1696 = vmatpush3.msra.mxu0 %v2302_v61  ;;  %1723 = vmatpush3.msra.mxu1 %v2193_v17 }
  0x5e   :  { %1697 = vmatprep.subr.mxu0 %v2126_v0  ;;  %1724 = vmatprep.subr.mxu1 %v2126_v0 }
  0x5f   :  { %1698 = vmatpush3.msra.mxu0 %v2321_v8  ;;  %1725 = vmatpush3.msra.mxu1 %v2215_v25 }
  0x60   :  { %1699 = vmatprep.subr.mxu0 %v2126_v0  ;;  %1726 = vmatprep.subr.mxu1 %v2126_v0 }
  0x61   :  { %1700 = vmatpush3.msra.mxu0 %v2341_v31  ;;  %1727 = vmatpush3.msra.mxu1 %v2221_v28 }
  0x62   :  { %1701 = vmatprep.subr.mxu0 %v2126_v0  ;;  %1728 = vmatprep.subr.mxu1 %v2126_v0 }
  0x63   :  { %1702 = vmatpush3.msra.mxu0 %v2357_v41  ;;  %1729 = vmatpush3.msra.mxu1 %v2240_v35 }
  0x64   :  { %1703 = vmatprep.subr.mxu0 %v2126_v0  ;;  %1730 = vmatprep.subr.mxu1 %v2126_v0 }
  0x65   :  { %1704 = vmatpush3.msra.mxu0 %v2372_v54  ;;  %1731 = vmatpush3.msra.mxu1 %v2262_v45 }
  0x66   :  { %1705 = vmatprep.subr.mxu0 %v2126_v0  ;;  %1732 = vmatprep.subr.mxu1 %v2126_v0 }
  0x67   :  { %1706 = vmatpush3.msra.mxu0 %v2386_v14  ;;  %1707 = vmatprep.mubr.msk.f32.mxu0 %vm2127_vm0, %v2126_v0 }
  0x68   :  { %1733 = vmatpush3.msra.mxu1 %v2272_v48  ;;  %1708 = vmatmul.mubr.f32.vlgmr.msra.gmra.mxu0 %v2338_v26  ;;  %v2839_v26 = vld [vmem:[#allocation13_spill] sm:$0xff] }
  0x69   :  { %1734 = vmatprep.subr.mxu1 %v2126_v0  ;;  %1745 = vmatprep.subr.mxu0 %v2126_v0 }
  0x6a   :  { %1735 = vmatpush3.msra.mxu1 %v2299_v59  ;;  %1746 = vmatpush3.msra.mxu0 %v2207_v22 }
  0x6b   :  { %1736 = vmatprep.subr.mxu1 %v2126_v0  ;;  %1747 = vmatprep.subr.mxu0 %v2126_v0 }
  0x6c   :  { %1737 = vmatpush3.msra.mxu1 %v2309_v63  ;;  %1748 = vmatpush3.msra.mxu0 %v2210_v23 }
  0x6d   :  { %1738 = vmatprep.subr.mxu1 %v2126_v0  ;;  %1749 = vmatprep.subr.mxu0 %v2126_v0 }
  0x6e   :  { %1739 = vmatpush3.msra.mxu1 %v2327_v13  ;;  %1750 = vmatpush3.msra.mxu0 %v2213_v24 }
  0x6f   :  { %1740 = vmatprep.subr.mxu1 %v2126_v0  ;;  %1751 = vmatprep.subr.mxu0 %v2126_v0 }
  0x70   :  { %1741 = vmatpush3.msra.mxu1 %v2345_v32  ;;  %1742 = vmatprep.mubr.msk.f32.mxu1 %vm2127_vm0, %v2126_v0 }
  0x71   :  { %1752 = vmatpush3.msra.mxu0 %v2219_v27  ;;  %1743 = vmatmul.mubr.f32.vlgmr.msra.gmra.mxu1 %v2837_v44  ;;  %v2842_v44 = vld [vmem:[#allocation16_spill] sm:$0xff] }
  0x72   :  { %1753 = vmatprep.subr.mxu0 %v2126_v0  ;;  %1780 = vmatprep.subr.mxu1 %v2126_v0 }
  0x73   :  { %1754 = vmatpush3.msra.mxu0 %v2224_v29  ;;  %1781 = vmatpush3.msra.mxu1 %v2174_v4 }
  0x74   :  { %1755 = vmatprep.subr.mxu0 %v2126_v0  ;;  %1782 = vmatprep.subr.mxu1 %v2126_v0 }
  0x75   :  { %1756 = vmatpush3.msra.mxu0 %v2250_v40  ;;  %1783 = vmatpush3.msra.mxu1 %v2176_v5 }
  0x76   :  { %1757 = vmatprep.subr.mxu0 %v2126_v0  ;;  %1784 = vmatprep.subr.mxu1 %v2126_v0 }
  0x77   :  { %1758 = vmatpush3.msra.mxu0 %v2265_v46  ;;  %1785 = vmatpush3.msra.mxu1 %v2178_v6 }
  0x78   :  { %1759 = vmatprep.subr.mxu0 %v2126_v0  ;;  %1786 = vmatprep.subr.mxu1 %v2126_v0 }
  0x79   :  { %1760 = vmatpush3.msra.mxu0 %v2283_v53  ;;  %1787 = vmatpush3.msra.mxu1 %v2180_v10 }
  0x7a   :  { %1761 = vmatprep.subr.mxu0 %v2126_v0  ;;  %1788 = vmatprep.subr.mxu1 %v2126_v0 }
  0x7b   :  { %1762 = vmatpush3.msra.mxu0 %v2293_v57  ;;  %1789 = vmatpush3.msra.mxu1 %v2182_v11 }
  0x7c   :  { %1763 = vmatprep.subr.mxu0 %v2126_v0  ;;  %1790 = vmatprep.subr.mxu1 %v2126_v0 }
  0x7d   :  { %1764 = vmatpush3.msra.mxu0 %v2318_v3  ;;  %1791 = vmatpush3.msra.mxu1 %v2184_v12 }
  0x7e   :  { %1765 = vmatprep.subr.mxu0 %v2126_v0  ;;  %1792 = vmatprep.subr.mxu1 %v2126_v0 }
  0x7f   :  { %1766 = vmatpush3.msra.mxu0 %v2334_v19  ;;  %1793 = vmatpush3.msra.mxu1 %v2193_v17 }
  0x80   :  { %1767 = vmatprep.subr.mxu0 %v2126_v0  ;;  %1794 = vmatprep.subr.mxu1 %v2126_v0 }
  0x81   :  { %1768 = vmatpush3.msra.mxu0 %v2354_v39  ;;  %1795 = vmatpush3.msra.mxu1 %v2215_v25 }
  0x82   :  { %1769 = vmatprep.subr.mxu0 %v2126_v0  ;;  %1796 = vmatprep.subr.mxu1 %v2126_v0 }
  0x83   :  { %1770 = vmatpush3.msra.mxu0 %v2369_v58  ;;  %1797 = vmatpush3.msra.mxu1 %v2221_v28 }
  0x84   :  { %1771 = vmatprep.subr.mxu0 %v2126_v0  ;;  %1798 = vmatprep.subr.mxu1 %v2126_v0 }
  0x85   :  { %1772 = vmatpush3.msra.mxu0 %v2383_v52  ;;  %1799 = vmatpush3.msra.mxu1 %v2240_v35 }
  0x86   :  { %1773 = vmatprep.subr.mxu0 %v2126_v0  ;;  %1800 = vmatprep.subr.mxu1 %v2126_v0 }
  0x87   :  { %1774 = vmatpush3.msra.mxu0 %v2400_v7  ;;  %1801 = vmatpush3.msra.mxu1 %v2262_v45 }
  0x88   :  { %1775 = vmatprep.subr.mxu0 %v2126_v0  ;;  %1802 = vmatprep.subr.mxu1 %v2126_v0 }
  0x89   :  { %1776 = vmatpush3.msra.mxu0 %v2411_v36  ;;  %1777 = vmatprep.mubr.msk.f32.mxu0 %vm2127_vm0, %v2126_v0 }
  0x8a   :  { %1803 = vmatpush3.msra.mxu1 %v2272_v48  ;;  %1778 = vmatmul.mubr.f32.vlgmr.msra.gmra.mxu0 %v2305_v62 }
  0x8b   :  { %1804 = vmatprep.subr.mxu1 %v2126_v0  ;;  %1815 = vmatprep.subr.mxu0 %v2126_v0 }
  0x8c   :  { %1805 = vmatpush3.msra.mxu1 %v2299_v59  ;;  %1816 = vmatpush3.msra.mxu0 %v2174_v4 }
  0x8d   :  { %1806 = vmatprep.subr.mxu1 %v2126_v0  ;;  %1817 = vmatprep.subr.mxu0 %v2126_v0 }
  0x8e   :  { %1807 = vmatpush3.msra.mxu1 %v2309_v63  ;;  %1818 = vmatpush3.msra.mxu0 %v2176_v5 }
  0x8f   :  { %1808 = vmatprep.subr.mxu1 %v2126_v0  ;;  %1819 = vmatprep.subr.mxu0 %v2126_v0 }
  0x90   :  { %1809 = vmatpush3.msra.mxu1 %v2327_v13  ;;  %1820 = vmatpush3.msra.mxu0 %v2178_v6 }
  0x91   :  { %1810 = vmatprep.subr.mxu1 %v2126_v0  ;;  %1821 = vmatprep.subr.mxu0 %v2126_v0 }
  0x92   :  { %1811 = vmatpush3.msra.mxu1 %v2345_v32  ;;  %1812 = vmatprep.mubr.msk.f32.mxu1 %vm2127_vm0, %v2126_v0 }
  0x93   :  { %1822 = vmatpush3.msra.mxu0 %v2180_v10  ;;  %1813 = vmatmul.mubr.f32.vlgmr.msra.gmra.mxu1 %v2305_v62  ;;  %v2838_v62 = vld [vmem:[#allocation12_spill] sm:$0xff] }
  0x94   :  { %1823 = vmatprep.subr.mxu0 %v2126_v0  ;;  %1850 = vmatprep.subr.mxu1 %v2126_v0 }
  0x95   :  { %1824 = vmatpush3.msra.mxu0 %v2182_v11  ;;  %1851 = vmatpush3.msra.mxu1 %v2243_v37  ;;  %v2605_v37 = vand.u32 4294901760, %v716_v56 }
  0x96   :  { %1825 = vmatprep.subr.mxu0 %v2126_v0  ;;  %1852 = vmatprep.subr.mxu1 %v2126_v0 }
  0x97   :  { %1826 = vmatpush3.msra.mxu0 %v2184_v12  ;;  %1853 = vmatpush3.msra.mxu1 %v2245_v38  ;;  %v2840_v38 = vld [vmem:[#allocation14_spill] sm:$0xff]  ;;  %v2616_v42 = vsub.f32 %v716_v56, %v2605_v37  ;;  %v2843_v56 = vld [vmem:[#allocation17_spill] sm:$0xff] }
  0x98   :  { %1827 = vmatprep.subr.mxu0 %v2126_v0  ;;  %1854 = vmatprep.subr.mxu1 %v2126_v0 }
  0x99   :  { %1828 = vmatpush3.msra.mxu0 %v2193_v17  ;;  %1855 = vmatpush3.msra.mxu1 %v2838_v62  ;;  %v800_v62 = vand.u32 4294901760, %v2616_v42 }
  0x9a   :  { %1829 = vmatprep.subr.mxu0 %v2126_v0  ;;  %1856 = vmatprep.subr.mxu1 %v2126_v0 }
  0x9b   :  { %1830 = vmatpush3.msra.mxu0 %v2215_v25  ;;  %1857 = vmatpush3.msra.mxu1 %v2839_v26  ;;  %v2844_v26 = vld [vmem:[#allocation18_spill] sm:$0xff] }
  0x9c   :  { %1831 = vmatprep.subr.mxu0 %v2126_v0  ;;  %1858 = vmatprep.subr.mxu1 %v2126_v0 }
  0x9d   :  { %1832 = vmatpush3.msra.mxu0 %v2221_v28  ;;  %1859 = vmatpush3.msra.mxu1 %v2840_v38  ;;  %v801_v38 = vsub.f32 %v2616_v42, %v800_v62 }
  0x9e   :  { %1833 = vmatprep.subr.mxu0 %v2126_v0  ;;  %1860 = vmatprep.subr.mxu1 %v2126_v0 }
  0x9f   :  { %1834 = vmatpush3.msra.mxu0 %v2240_v35  ;;  %1861 = vmatpush3.msra.mxu1 %v2841_v9  ;;  %v2845_v9 = vld [vmem:[#allocation19_spill] sm:$0xff] }
  0xa0   :  { %1835 = vmatprep.subr.mxu0 %v2126_v0  ;;  %1862 = vmatprep.subr.mxu1 %v2126_v0 }
  0xa1   :  { %1836 = vmatpush3.msra.mxu0 %v2262_v45  ;;  %1863 = vmatpush3.msra.mxu1 %v2842_v44  ;;  %v802_v44 = vand.u32 4294901760, %v801_v38 }
  0xa2   :  { %1837 = vmatprep.subr.mxu0 %v2126_v0  ;;  %1864 = vmatprep.subr.mxu1 %v2126_v0 }
  0xa3   :  { %1838 = vmatpush3.msra.mxu0 %v2272_v48  ;;  %1865 = vmatpush3.msra.mxu1 %v2843_v56 }
  0xa4   :  { %1839 = vmatprep.subr.mxu0 %v2126_v0  ;;  %1866 = vmatprep.subr.mxu1 %v2126_v0 }
  0xa5   :  { %1840 = vmatpush3.msra.mxu0 %v2299_v59  ;;  %1867 = vmatpush3.msra.mxu1 %v2844_v26 }
  0xa6   :  { %1841 = vmatprep.subr.mxu0 %v2126_v0  ;;  %1868 = vmatprep.subr.mxu1 %v2126_v0 }
  0xa7   :  { %1842 = vmatpush3.msra.mxu0 %v2309_v63  ;;  %1869 = vmatpush3.msra.mxu1 %v2845_v9 }
  0xa8   :  { %1843 = vmatprep.subr.mxu0 %v2126_v0  ;;  %1870 = vmatprep.subr.mxu1 %v2126_v0 }
  0xa9   :  { %1844 = vmatpush3.msra.mxu0 %v2327_v13  ;;  %1871 = vmatpush3.msra.mxu1 %v2392_v60 }
  0xaa   :  { %1845 = vmatprep.subr.mxu0 %v2126_v0  ;;  %1872 = vmatprep.subr.mxu1 %v2126_v0 }
  0xab   :  { %1846 = vmatpush3.msra.mxu0 %v2345_v32  ;;  %1873 = vmatpush3.msra.mxu1 %v2406_v49 }
  0xac   :  { %1847 = vmatprep.mubr.msk.f32.mxu0 %vm2127_vm0, %v2126_v0  ;;  %1874 = vmatprep.subr.mxu1 %v2126_v0 }
  0xad   :  { %1885 = vmatprep.subr.mxu0 %v2126_v0  ;;  %1848 = vmatmul.mubr.f32.vlgmr.msra.gmra.mxu0 %v802_v44 }
  0xae   :  { %1875 = vmatpush3.msra.mxu1 %v2417_v51  ;;  %1886 = vmatpush3.msra.mxu0 %v2188_v15 }
  0xaf   :  { %1876 = vmatprep.subr.mxu1 %v2126_v0  ;;  %1887 = vmatprep.subr.mxu0 %v2126_v0 }
  0xb0   :  { %1877 = vmatpush3.msra.mxu1 %v2425_v2  ;;  %1888 = vmatpush3.msra.mxu0 %v2191_v16 }
  0xb1   :  { %1878 = vmatprep.subr.mxu1 %v2126_v0  ;;  %1889 = vmatprep.subr.mxu0 %v2126_v0 }
  0xb2   :  { %1879 = vmatpush3.msra.mxu1 %v2432_v1  ;;  %1890 = vmatpush3.msra.mxu0 %v2196_v18 }
  0xb3   :  { %1880 = vmatprep.subr.mxu1 %v2126_v0  ;;  %1891 = vmatprep.subr.mxu0 %v2126_v0 }
  0xb4   :  { %1881 = vmatpush3.msra.mxu1 %v2438_v33  ;;  %1882 = vmatprep.mubr.msk.f32.mxu1 %vm2127_vm0, %v2126_v0 }
  0xb5   :  { %1892 = vmatpush3.msra.mxu0 %v2200_v20  ;;  %1883 = vmatmul.mubr.f32.vlgmr.msra.gmra.mxu1 %v2605_v37 }
  0xb6   :  { %1893 = vmatprep.subr.mxu0 %v2126_v0  ;;  %1920 = vmatprep.subr.mxu1 %v2126_v0 }
  0xb7   :  { %1894 = vmatpush3.msra.mxu0 %v2203_v21  ;;  %1921 = vmatpush3.msra.mxu1 %v2174_v4 }
  0xb8   :  { %1895 = vmatprep.subr.mxu0 %v2126_v0  ;;  %1922 = vmatprep.subr.mxu1 %v2126_v0 }
  0xb9   :  { %1896 = vmatpush3.msra.mxu0 %v2227_v30  ;;  %1923 = vmatpush3.msra.mxu1 %v2176_v5 }
  0xba   :  { %1897 = vmatprep.subr.mxu0 %v2126_v0  ;;  %1924 = vmatprep.subr.mxu1 %v2126_v0 }
  0xbb   :  { %1898 = vmatpush3.msra.mxu0 %v2237_v34  ;;  %1925 = vmatpush3.msra.mxu1 %v2178_v6 }
  0xbc   :  { %1899 = vmatprep.subr.mxu0 %v2126_v0  ;;  %1926 = vmatprep.subr.mxu1 %v2126_v0 }
  0xbd   :  { %1900 = vmatpush3.msra.mxu0 %v2256_v43  ;;  %1927 = vmatpush3.msra.mxu1 %v2180_v10 }
  0xbe   :  { %1901 = vmatprep.subr.mxu0 %v2126_v0  ;;  %1928 = vmatprep.subr.mxu1 %v2126_v0 }
  0xbf   :  { %1902 = vmatpush3.msra.mxu0 %v2268_v47  ;;  %1929 = vmatpush3.msra.mxu1 %v2182_v11 }
  0xc0   :  { %1903 = vmatprep.subr.mxu0 %v2126_v0  ;;  %1930 = vmatprep.subr.mxu1 %v2126_v0 }
  0xc1   :  { %1904 = vmatpush3.msra.mxu0 %v2286_v55  ;;  %1931 = vmatpush3.msra.mxu1 %v2184_v12 }
  0xc2   :  { %1905 = vmatprep.subr.mxu0 %v2126_v0  ;;  %1932 = vmatprep.subr.mxu1 %v2126_v0 }
  0xc3   :  { %1906 = vmatpush3.msra.mxu0 %v2302_v61  ;;  %1933 = vmatpush3.msra.mxu1 %v2193_v17 }
  0xc4   :  { %1907 = vmatprep.subr.mxu0 %v2126_v0  ;;  %1934 = vmatprep.subr.mxu1 %v2126_v0 }
  0xc5   :  { %1908 = vmatpush3.msra.mxu0 %v2321_v8  ;;  %1935 = vmatpush3.msra.mxu1 %v2215_v25 }
  0xc6   :  { %1909 = vmatprep.subr.mxu0 %v2126_v0  ;;  %1936 = vmatprep.subr.mxu1 %v2126_v0 }
  0xc7   :  { %1910 = vmatpush3.msra.mxu0 %v2341_v31  ;;  %1937 = vmatpush3.msra.mxu1 %v2221_v28  ;;  %v1400_v31 = vld [vmem:[%s2817_s3] ss:$0 sm:$0xff] }
  0xc8   :  { %1911 = vmatprep.subr.mxu0 %v2126_v0  ;;  %1938 = vmatprep.subr.mxu1 %v2126_v0 }
  0xc9   :  { %1912 = vmatpush3.msra.mxu0 %v2357_v41  ;;  %1939 = vmatpush3.msra.mxu1 %v2240_v35 }
  0xca   :  { %1913 = vmatprep.subr.mxu0 %v2126_v0  ;;  %1940 = vmatprep.subr.mxu1 %v2126_v0 }
  0xcb   :  { %1914 = vmatpush3.msra.mxu0 %v2372_v54  ;;  %1941 = vmatpush3.msra.mxu1 %v2262_v45 }
  0xcc   :  { %1915 = vmatprep.subr.mxu0 %v2126_v0  ;;  %1942 = vmatprep.subr.mxu1 %v2126_v0 }
  0xcd   :  { %1916 = vmatpush3.msra.mxu0 %v2386_v14  ;;  %1917 = vmatprep.mubr.msk.f32.mxu0 %vm2127_vm0, %v2126_v0  ;;  %v1399_v14 = vld [vmem:[%s2816_s2] ss:$0 sm:$0xff] }
  0xce   :  { %1943 = vmatpush3.msra.mxu1 %v2272_v48  ;;  %1918 = vmatmul.mubr.f32.vlgmr.msra.gmra.mxu0 %v2616_v42 }
  0xcf   :  { %1944 = vmatprep.subr.mxu1 %v2126_v0  ;;  %1955 = vmatprep.subr.mxu0 %v2126_v0 }
  0xd0   :  { %1945 = vmatpush3.msra.mxu1 %v2299_v59  ;;  %1956 = vmatpush3.msra.mxu0 %v2207_v22 }
  0xd1   :  { %1946 = vmatprep.subr.mxu1 %v2126_v0  ;;  %1957 = vmatprep.subr.mxu0 %v2126_v0 }
  0xd2   :  { %1947 = vmatpush3.msra.mxu1 %v2309_v63  ;;  %1958 = vmatpush3.msra.mxu0 %v2210_v23 }
  0xd3   :  { %1948 = vmatprep.subr.mxu1 %v2126_v0  ;;  %1959 = vmatprep.subr.mxu0 %v2126_v0 }
  0xd4   :  { %1949 = vmatpush3.msra.mxu1 %v2327_v13  ;;  %1960 = vmatpush3.msra.mxu0 %v2213_v24 }
  0xd5   :  { %1950 = vmatprep.subr.mxu1 %v2126_v0  ;;  %1961 = vmatprep.subr.mxu0 %v2126_v0 }
  0xd6   :  { %1951 = vmatpush3.msra.mxu1 %v2345_v32  ;;  %1952 = vmatprep.mubr.msk.f32.mxu1 %vm2127_vm0, %v2126_v0 }
  0xd7   :  { %1962 = vmatpush3.msra.mxu0 %v2219_v27  ;;  %1953 = vmatmul.mubr.f32.vlgmr.msra.gmra.mxu1 %v800_v62 }
  0xd8   :  { %1963 = vmatprep.subr.mxu0 %v2126_v0  ;;  %1990 = vmatprep.subr.mxu1 %v2126_v0 }
  0xd9   :  { %1964 = vmatpush3.msra.mxu0 %v2224_v29  ;;  %1991 = vmatpush3.msra.mxu1 %v2174_v4 }
  0xda   :  { %1965 = vmatprep.subr.mxu0 %v2126_v0  ;;  %1992 = vmatprep.subr.mxu1 %v2126_v0 }
  0xdb   :  { %1966 = vmatpush3.msra.mxu0 %v2250_v40  ;;  %1993 = vmatpush3.msra.mxu1 %v2176_v5 }
  0xdc   :  { %1967 = vmatprep.subr.mxu0 %v2126_v0  ;;  %1994 = vmatprep.subr.mxu1 %v2126_v0 }
  0xdd   :  { %1968 = vmatpush3.msra.mxu0 %v2265_v46  ;;  %1995 = vmatpush3.msra.mxu1 %v2178_v6 }
  0xde   :  { %1969 = vmatprep.subr.mxu0 %v2126_v0  ;;  %1996 = vmatprep.subr.mxu1 %v2126_v0 }
  0xdf   :  { %1970 = vmatpush3.msra.mxu0 %v2283_v53  ;;  %1997 = vmatpush3.msra.mxu1 %v2180_v10 }
  0xe0   :  { %1971 = vmatprep.subr.mxu0 %v2126_v0  ;;  %1998 = vmatprep.subr.mxu1 %v2126_v0 }
  0xe1   :  { %1972 = vmatpush3.msra.mxu0 %v2293_v57  ;;  %1999 = vmatpush3.msra.mxu1 %v2182_v11 }
  0xe2   :  { %1973 = vmatprep.subr.mxu0 %v2126_v0  ;;  %2000 = vmatprep.subr.mxu1 %v2126_v0 }
  0xe3   :  { %1974 = vmatpush3.msra.mxu0 %v2318_v3  ;;  %2001 = vmatpush3.msra.mxu1 %v2184_v12 }
  0xe4   :  { %1975 = vmatprep.subr.mxu0 %v2126_v0  ;;  %2002 = vmatprep.subr.mxu1 %v2126_v0 }
  0xe5   :  { %1976 = vmatpush3.msra.mxu0 %v2334_v19  ;;  %2003 = vmatpush3.msra.mxu1 %v2193_v17 }
  0xe6   :  { %1977 = vmatprep.subr.mxu0 %v2126_v0  ;;  %2004 = vmatprep.subr.mxu1 %v2126_v0 }
  0xe7   :  { %1978 = vmatpush3.msra.mxu0 %v2354_v39  ;;  %2005 = vmatpush3.msra.mxu1 %v2215_v25  ;;  %v1380_v39 = vld [vmem:[#allocation5] sm:$0xff] }
  0xe8   :  { %1979 = vmatprep.subr.mxu0 %v2126_v0  ;;  %2006 = vmatprep.subr.mxu1 %v2126_v0 }
  0xe9   :  { %1980 = vmatpush3.msra.mxu0 %v2369_v58  ;;  %2007 = vmatpush3.msra.mxu1 %v2221_v28 }
  0xea   :  { %1981 = vmatprep.subr.mxu0 %v2126_v0  ;;  %2008 = vmatprep.subr.mxu1 %v2126_v0 }
  0xeb   :  { %1982 = vmatpush3.msra.mxu0 %v2383_v52  ;;  %2009 = vmatpush3.msra.mxu1 %v2240_v35 }
  0xec   :  { %1983 = vmatprep.subr.mxu0 %v2126_v0  ;;  %2010 = vmatprep.subr.mxu1 %v2126_v0 }
  0xed   :  { %1984 = vmatpush3.msra.mxu0 %v2400_v7  ;;  %2011 = vmatpush3.msra.mxu1 %v2262_v45 }
  0xee   :  { %1985 = vmatprep.subr.mxu0 %v2126_v0  ;;  %2012 = vmatprep.subr.mxu1 %v2126_v0 }
  0xef   :  { %1986 = vmatpush3.msra.mxu0 %v2411_v36  ;;  %1987 = vmatprep.mubr.msk.f32.mxu0 %vm2127_vm0, %v2126_v0 }
  0xf0   :  { %2013 = vmatpush3.msra.mxu1 %v2272_v48  ;;  %1988 = vmatmul.mubr.f32.vlgmr.msra.gmra.mxu0 %v2605_v37 }
  0xf1   :  { %2014 = vmatprep.subr.mxu1 %v2126_v0  ;;  %2022 = vmatprep.mubr.msk.f32.mxu1 %vm2127_vm0, %v2126_v0 }
  0xf2   :  { %2015 = vmatpush3.msra.mxu1 %v2299_v59 }
  0xf3   :  { %2016 = vmatprep.subr.mxu1 %v2126_v0 }
  0xf4   :  { %2017 = vmatpush3.msra.mxu1 %v2309_v63 }
  0xf5   :  { %2018 = vmatprep.subr.mxu1 %v2126_v0 }
  0xf6   :  { %2019 = vmatpush3.msra.mxu1 %v2327_v13 }
  0xf7   :  { %2020 = vmatprep.subr.mxu1 %v2126_v0 }
  0xf8   :  { %2021 = vmatpush3.msra.mxu1 %v2345_v32 }
  0xf9   :  { %2023 = vmatmul.mubr.f32.vlgmr.msra.gmra.mxu1 %v2605_v37 }
 0x108   :  { %v162_v4 = vpop.f32.mrf.mxu0 }
 0x10a   :  { %v1639_v5 = vpop.f32.mrf.mxu0 }
 0x10f   :  { %v313_v6 = vpop.f32.mrf.mxu1 }
 0x110   :  { %v314_v10 = vadd.f32 %v313_v6, %v162_v4 }
 0x111   :  { %v1674_v11 = vpop.f32.mrf.mxu1 }
 0x128   :  { %v417_v12 = vpop.f32.mrf.mxu0 }
 0x129   :  { %v418_v15 = vadd.f32 %v417_v12, %v314_v10 }
 0x12a   :  { %v1709_v16 = vpop.f32.mrf.mxu0 }
 0x131   :  { %v506_v17 = vpop.f32.mrf.mxu1 }
 0x132   :  { %v507_v18 = vadd.f32 %v506_v17, %v418_v15 }
 0x133   :  { %v1744_v20 = vpop.f32.mrf.mxu1 }
 0x14a   :  { %v625_v21 = vpop.f32.mrf.mxu0 }
 0x14b   :  { %v626_v22 = vadd.f32 %v625_v21, %v507_v18 }
 0x14c   :  { %v1779_v23 = vpop.f32.mrf.mxu0 }
 0x153   :  { %v712_v24 = vpop.f32.mrf.mxu1 }
 0x154   :  { %v713_v0 = vadd.f32 %v712_v24, %v626_v22 }
 0x155   :  { %v1814_v25 = vpop.f32.mrf.mxu1 }
 0x156   :  { %v1358_v57 = vmul.f32 %v713_v0, %v713_v0  ;;  %v1360_v8 = vsub.f32 %v2274_v50, %v713_v0 }
 0x16d   :  { %v804_v27 = vpop.f32.mrf.mxu0 }
 0x16f   :  { %v1849_v28 = vpop.f32.mrf.mxu0 }
 0x175   :  { %v955_v29 = vpop.f32.mrf.mxu1 }
 0x176   :  { %v956_v46 = vadd.f32 %v955_v29, %v804_v27 }
 0x177   :  { %v1884_v30 = vpop.f32.mrf.mxu1 }
 0x18e   :  { %v1059_v34 = vpop.f32.mrf.mxu0 }
 0x18f   :  { %v1060_v48 = vadd.f32 %v1059_v34, %v956_v46 }
 0x190   :  { %v1919_v35 = vpop.f32.mrf.mxu0 }
 0x197   :  { %v1148_v40 = vpop.f32.mrf.mxu1 }
 0x198   :  { %v1149_v51 = vadd.f32 %v1148_v40, %v1060_v48 }
 0x199   :  { %v1954_v43 = vpop.f32.mrf.mxu1 }
 0x1b0   :  { %v1267_v45 = vpop.f32.mrf.mxu0 }
 0x1b1   :  { %v1268_v53 = vadd.f32 %v1267_v45, %v1149_v51 }
 0x1b2   :  { %v1989_v47 = vpop.f32.mrf.mxu0 }
 0x1b9   :  { %v1354_v55 = vpop.f32.mrf.mxu1 }
 0x1ba   :  { %v1355_v59 = vadd.f32 %v1354_v55, %v1268_v53 }
 0x1bb   :  { %v2024_v61 = vpop.f32.mrf.mxu1 }
 0x1bc   :  { %v1359_v63 = vsub.f32 %v1355_v59, %v1358_v57 }
 0x1be   :  { %v1361_v3 = vadd.f32 1e-05, %v1359_v63 }
 0x1c0   :  { %2033 = vrsqrt.f32 %v1361_v3 }
 0x1cd   :  { %v2034_v13 = vpop.eup %2033 }
 0x1ce   :  { %v1363_v19 = vmul.f32 %v2034_v13, %v1360_v8 }
 0x1d0   :  { %v1371_v32 = vmul.f32 %v1399_v14, %v1363_v19 }
 0x1d2   :  { %v1379_v41 = vadd.f32 %v1400_v31, %v1371_v32 }
 0x1d4   :  { %v1381_v52 = vmul.f32 %v1380_v39, %v1379_v41 }
 0x1d6   :  { %1382 = vst [vmem:[#allocation8] sm:$0xff] %v1381_v52 }
 0x1d7   :  { %2106 = shalt.err (!%p2103_p5)
}
 0x1d8   :  { %1392 = dma.vmem_to_hbm [thread:$0]  %s1390_s12, 128, %s2819_s5, [#allocation4]  }
 0x1d9   :  { %2119 = dma.done.wait [#allocation4], 128  }
 0x1da   :  { %2120 = vsyncadd [#allocation4], 4294967168 }
 0x1db   :  { %1396 = vsyncpa [#allocation3], 1 }
 0x1dc   :  { %1397 = vsyncpa [#allocation6], 1 }
 0x1dd   :  { %1398 = vsyncpa [#allocation4], 1 }

</bundles_post_ra>
